<compile_context>
chip_gen: v7x
topology: tpu7x:2x2x1
jax: 0.10.0
libtpu: 0.0.40
codegen_flags: <defaults>
</compile_context>

<pallas_src>
import functools

import numpy as np
import jax
import jax.numpy as jnp
from jax.experimental import pallas as pl
from jax.experimental.pallas import tpu as pltpu


def _round_up(x, m):
    return ((x + m - 1) // m) * m


def _pad2d(a, rows, cols):
    return jnp.pad(a, ((0, rows - a.shape[0]), (0, cols - a.shape[1])))


# ----------------------------- Pallas kernel ------------------------------ #
def _mbconv1_kernel(x_ref, wdw_ref, vec_ref, mask_ref, wpw_ref,
                    wse1_ref, bse1_ref, wse2_ref, wfin_ref, bfin_ref,
                    out_ref, *, ksize, wp, lanes):
    # x_ref    : (C_pad, L)      flattened zero-padded input, row pitch = wp
    # mask_ref : (1, lanes)      1/HW on valid (strided) output lanes, else 0
    # out_ref  : (Cout_pad, lanes) full padded result (compacted in wrapper)
    C = wpw_ref.shape[1]

    # ---- depthwise conv: one row-slab load per dy, dx shifts on the XLU ----
    acc = jnp.zeros((C, lanes), jnp.float32)
    for dy in range(ksize):
        slab = x_ref[:, pl.ds(dy * wp, lanes)]          # one vld slab per dy
        for dx in range(ksize):
            # left-shift by dx lanes; wrap-around only touches junk lanes
            patch = slab if dx == 0 else pltpu.roll(slab, shift=lanes - dx,
                                                    axis=1)
            t = dy * ksize + dx
            acc = acc + patch * wdw_ref[:, t:t + 1]

    dw_shift = vec_ref[:, 0:1]
    pw_shift = vec_ref[:, 1:2]
    bn2_scale = vec_ref[:, 2:3]
    bn2_shift = vec_ref[:, 3:4]
    b_se2 = vec_ref[:, 4:5]

    # depthwise BN shift (scale pre-folded into the taps) + ReLU
    h = jnp.maximum(acc + dw_shift, 0.0)

    # pointwise 1x1 conv (BN scale folded into rows) + BN shift + ReLU
    hf = jnp.dot(wpw_ref[...], h, preferred_element_type=jnp.float32)
    hf = jnp.maximum(hf + pw_shift, 0.0)

    # outer BatchNorm + Swish (module defines Swish as x + sigmoid(x))
    hf = hf * bn2_scale + bn2_shift
    hf = hf + jax.nn.sigmoid(hf)

    # SE block: masked global average pool (mask already holds the 1/HW weights)
    pooled = jnp.sum(hf * mask_ref[...], axis=1, keepdims=True)       # (C, 1)
    s1 = jnp.dot(wse1_ref[...], pooled,
                 preferred_element_type=jnp.float32) + bse1_ref[...]  # (4C, 1)
    s1 = s1 + jax.nn.sigmoid(s1)
    gate = jax.nn.sigmoid(
        jnp.dot(wse2_ref[...], s1, preferred_element_type=jnp.float32) + b_se2)
    hf = hf * gate

    # final 1x1 conv + BN (both folded into wfin/bfin); one dense lane-wide store
    of = jnp.dot(wfin_ref[...], hf,
                 preferred_element_type=jnp.float32) + bfin_ref[...]
    out_ref[...] = of.astype(out_ref.dtype)


# ------------------------------- wrapper ----------------------------------- #
def mbconv1_forward(x_nchw, params, *, kernel_size, stride):
    N, C, H, W = x_nchw.shape
    k = kernel_size
    Cout = params["w_final"].shape[1]
    pad = {3: 1, 5: 2}.get(k, 0)
    Hp, Wp = H + 2 * pad, W + 2 * pad
    h1, w1 = Hp - k + 1, Wp - k + 1                 # stride-1 dw output extent
    h_out = (Hp - k) // stride + 1
    w_out = (Wp - k) // stride + 1
    shortcut = (stride == 1) and (C == Cout)

    # lane-dense, 128-aligned working geometry
    Lw = h1 * Wp                                    # valid working lanes
    Lp = _round_up(Lw, 128)                         # padded working lanes
    L = _round_up((k - 1) * Wp + Lp, 128)           # flat input length
    C_pad = _round_up(C, 8)
    Cout_pad = _round_up(Cout, 8)
    Cse = 4 * C
    Cse_pad = _round_up(Cse, 8)

    # spatial zero-padding + flatten (row pitch = Wp); pad channels to C_pad
    # and the flat axis to L so every dy-slab load stays in bounds.
    x = x_nchw.astype(jnp.float32)
    xpad = jnp.pad(x, ((0, 0), (0, 0), (pad, pad), (pad, pad)))
    xflat = xpad.reshape(N, C, Hp * Wp)
    xflat = jnp.pad(xflat, ((0, 0), (0, C_pad - C), (0, L - Hp * Wp)))

    # compile-time SE-pool mask: 1/(h_out*w_out) on the strided output lanes.
    mask_np = np.zeros((1, Lp), np.float32)
    inv_hw = 1.0 / float(h_out * w_out)
    for r in range(h_out):
        for c in range(w_out):
            mask_np[0, (r * stride) * Wp + c * stride] = inv_hw
    mask = jnp.asarray(mask_np)

    # ---- fold BN scales into adjacent conv weights (eval mode), pad to tile ----
    dw_scale, dw_shift = params["dw_scale"][0], params["dw_shift"][0]
    pw_scale, pw_shift = params["pw_scale"][0], params["pw_shift"][0]
    bn2_scale, bn2_shift = params["bn2_scale"][0], params["bn2_shift"][0]
    bn3_scale, bn3_shift = params["bn3_scale"][0], params["bn3_shift"][0]

    w_dw_f = (jnp.transpose(params["w_dw"], (2, 0, 1))
              * dw_scale[:, None, None]).reshape(C, k * k)
    w_dw_f = _pad2d(w_dw_f, C_pad, k * k)                            # (Cp, k*k)
    vecs = jnp.stack([dw_shift, pw_shift, bn2_scale, bn2_shift,
                      params["b_se2"][0]], axis=1)
    vecs = _pad2d(vecs, C_pad, 5)                                    # (Cp, 5)
    w_pw_f = _pad2d(params["w_pw"].T * pw_scale[:, None], C_pad, C_pad)
    w_se1_k = _pad2d(params["w_se1"].T, Cse_pad, C_pad)              # (4Cp, Cp)
    b_se1_k = _pad2d(params["b_se1"].reshape(Cse, 1), Cse_pad, 1)
    w_se2_k = _pad2d(params["w_se2"].T, C_pad, Cse_pad)              # (Cp, 4Cp)
    w_fin_f = _pad2d(params["w_final"].T * bn3_scale[:, None], Cout_pad, C_pad)
    b_fin_f = _pad2d((params["b_final"][0] * bn3_scale
                      + bn3_shift).reshape(Cout, 1), Cout_pad, 1)

    kern = functools.partial(_mbconv1_kernel, ksize=k, wp=Wp, lanes=Lp)

    weights = (w_dw_f, vecs, mask, w_pw_f, w_se1_k, b_se1_k, w_se2_k,
               w_fin_f, b_fin_f)
    in_specs = [pl.BlockSpec((None, C_pad, L), lambda n: (n, 0, 0))]
    in_specs += [pl.BlockSpec(w.shape, lambda n: (0, 0)) for w in weights]

    # advisory cost hint for XLA's scheduler
    flops = int(N * (2 * Lp * C_pad * (k * k + C_pad + Cout_pad)
                     + 4 * C_pad * Cse_pad + 12 * Lp * C_pad))
    trans = int(N * (Lp * C_pad + 2 * Cse_pad + 2 * C_pad))
    bytes_acc = int(4 * (N * C_pad * L + N * Cout_pad * Lp
                         + sum(int(w.size) for w in weights)))
    cost = pl.CostEstimate(flops=flops, transcendentals=trans,
                           bytes_accessed=bytes_acc)

    out = pl.pallas_call(
        kern,
        out_shape=jax.ShapeDtypeStruct((N, Cout_pad, Lp), jnp.float32),
        grid=(N,),
        in_specs=in_specs,
        out_specs=pl.BlockSpec((None, Cout_pad, Lp), lambda n: (n, 0, 0)),
        compiler_params=pltpu.CompilerParams(
            dimension_semantics=("parallel",),
            vmem_limit_bytes=32 * 1024 * 1024),
        cost_estimate=cost,
    )(xflat, *weights)

    # wrapper-side compaction: drop padded channels / junk lanes, subsample
    # the stride-1 grid for stride>1.
    y = out[:, :Cout, :Lw].reshape(N, Cout, h1, Wp)
    y = y[:, :, ::stride, ::stride][:, :, :h_out, :w_out]
    if shortcut:
        y = y + x                                   # residual add outside kernel
    return y                                        # NCHW


# ----------------------- deterministic parameter init ---------------------- #
def _fold_bn(gamma, beta, mean, var, eps=1e-5):
    scale = gamma / jnp.sqrt(var + eps)
    shift = beta - mean * scale
    return scale.reshape(1, -1), shift.reshape(1, -1)


def init_params(key, in_channels, out_channels, kernel_size):
    C, Cout, k = in_channels, out_channels, kernel_size
    keys = jax.random.split(key, 20)
    p = {}
    p["w_dw"] = jax.random.normal(keys[0], (k, k, C), jnp.float32) * 0.2
    p["dw_scale"], p["dw_shift"] = _fold_bn(
        1.0 + 0.1 * jax.random.normal(keys[1], (C,)),
        0.1 * jax.random.normal(keys[2], (C,)),
        0.05 * jax.random.normal(keys[3], (C,)),
        1.0 + 0.1 * jax.random.uniform(keys[4], (C,)))
    p["w_pw"] = jax.random.normal(keys[5], (C, C), jnp.float32) * 0.2
    p["pw_scale"], p["pw_shift"] = _fold_bn(
        1.0 + 0.1 * jax.random.normal(keys[6], (C,)),
        0.1 * jax.random.normal(keys[7], (C,)),
        0.05 * jax.random.normal(keys[8], (C,)),
        1.0 + 0.1 * jax.random.uniform(keys[9], (C,)))
    p["bn2_scale"], p["bn2_shift"] = _fold_bn(
        1.0 + 0.1 * jax.random.normal(keys[10], (C,)),
        0.1 * jax.random.normal(keys[11], (C,)),
        0.05 * jax.random.normal(keys[12], (C,)),
        1.0 + 0.1 * jax.random.uniform(keys[13], (C,)))
    p["w_se1"] = jax.random.normal(keys[14], (C, 4 * C), jnp.float32) * 0.2
    p["b_se1"] = 0.1 * jax.random.normal(keys[15], (1, 4 * C), jnp.float32)
    p["w_se2"] = jax.random.normal(keys[16], (4 * C, C), jnp.float32) * 0.2
    p["b_se2"] = 0.1 * jax.random.normal(keys[17], (1, C), jnp.float32)
    p["w_final"] = jax.random.normal(keys[18], (C, Cout), jnp.float32) * 0.2
    p["b_final"] = 0.1 * jax.random.normal(keys[19], (1, Cout), jnp.float32)
    p["bn3_scale"], p["bn3_shift"] = _fold_bn(
        jnp.linspace(0.9, 1.1, Cout), jnp.linspace(-0.05, 0.05, Cout),
        jnp.linspace(-0.02, 0.02, Cout), jnp.linspace(0.95, 1.05, Cout))
    return p


# ------------------------- pure-JAX reference (check) ---------------------- #
def reference(x_nchw, params, *, kernel_size, stride):
    N, C, H, W = x_nchw.shape
    Cout = params["w_final"].shape[1]
    pad = {3: 1, 5: 2}.get(kernel_size, 0)
    shortcut = (stride == 1) and (C == Cout)
    x = jnp.transpose(x_nchw, (0, 2, 3, 1)).astype(jnp.float32)
    xpad = jnp.pad(x, ((0, 0), (pad, pad), (pad, pad), (0, 0)))
    y = jax.lax.conv_general_dilated(
        xpad, params["w_dw"][:, :, None, :], (stride, stride), "VALID",
        dimension_numbers=("NHWC", "HWIO", "NHWC"), feature_group_count=C)
    y = jnp.maximum(y * params["dw_scale"][0] + params["dw_shift"][0], 0.0)
    y = jnp.einsum("nhwc,cd->nhwd", y, params["w_pw"])
    y = jnp.maximum(y * params["pw_scale"][0] + params["pw_shift"][0], 0.0)
    y = y * params["bn2_scale"][0] + params["bn2_shift"][0]
    y = y + jax.nn.sigmoid(y)
    pooled = jnp.mean(y, axis=(1, 2))
    s1 = pooled @ params["w_se1"] + params["b_se1"]
    s1 = s1 + jax.nn.sigmoid(s1)
    gate = jax.nn.sigmoid(s1 @ params["w_se2"] + params["b_se2"])
    y = y * gate[:, None, None, :]
    y = jnp.einsum("nhwc,cd->nhwd", y, params["w_final"]) + params["b_final"][0]
    y = y * params["bn3_scale"][0] + params["bn3_shift"][0]
    if shortcut:
        y = y + x
    return jnp.transpose(y, (0, 3, 1, 2))


# ----------------------------------- main ----------------------------------- #
if __name__ == "__main__":
    key = jax.random.PRNGKey(0)

    # -- test 1: stride=1, C==Cout (shortcut path) --
    kx, kp = jax.random.split(key)
    x = jax.random.normal(kx, (2, 4, 16, 16), jnp.float32)
    params = init_params(kp, 4, 4, 3)
    out = mbconv1_forward(x, params, kernel_size=3, stride=1)
    out = jax.block_until_ready(out)
    ref = reference(x, params, kernel_size=3, stride=1)
    assert out.shape == ref.shape
    err = float(jnp.max(jnp.abs(out - ref)))
    assert jnp.allclose(out, ref, atol=1e-4, rtol=1e-4), f"stride=1 err {err}"

    # -- test 2: stride=2, C!=Cout (no shortcut, subsampled compaction) --
    kx2, kp2 = jax.random.split(kp)
    x2 = jax.random.normal(kx2, (2, 4, 16, 16), jnp.float32)
    params2 = init_params(kp2, 4, 8, 3)
    out2 = jax.block_until_ready(
        mbconv1_forward(x2, params2, kernel_size=3, stride=2))
    ref2 = reference(x2, params2, kernel_size=3, stride=2)
    assert out2.shape == ref2.shape
    err2 = float(jnp.max(jnp.abs(out2 - ref2)))
    assert jnp.allclose(out2, ref2, atol=1e-4, rtol=1e-4), f"stride=2 err {err2}"

    print("KERNEL_OK")
</pallas_src>

<mosaic_0001>
module attributes {stable_mosaic.version = 11 : i64} {
  func.func @_mbconv1_kernel(%arg0: i32, %arg1: memref<1x8x512xf32, #tpu.memory_space<vmem>>, %arg2: memref<8x9xf32, #tpu.memory_space<vmem>>, %arg3: memref<8x5xf32, #tpu.memory_space<vmem>>, %arg4: memref<1x384xf32, #tpu.memory_space<vmem>>, %arg5: memref<8x8xf32, #tpu.memory_space<vmem>>, %arg6: memref<16x8xf32, #tpu.memory_space<vmem>>, %arg7: memref<16x1xf32, #tpu.memory_space<vmem>>, %arg8: memref<8x16xf32, #tpu.memory_space<vmem>>, %arg9: memref<8x8xf32, #tpu.memory_space<vmem>>, %arg10: memref<8x1xf32, #tpu.memory_space<vmem>>, %arg11: memref<1x8x384xf32, #tpu.memory_space<vmem>>) attributes {dimension_semantics = [#tpu.dimension_semantics<parallel>], iteration_bounds = array<i64: 2>, scalar_prefetch = 0 : i64, scratch_operands = 0 : i64, tpu.core_type = #tpu.core_type<tc>, window_params = [{transform_indices = @transform_0, window_bounds = array<i64: 1, 8, 512>}, {pipeline_mode = #tpu.pipeline_mode<synchronous>, transform_indices = @transform_1, window_bounds = array<i64: 8, 9>}, {pipeline_mode = #tpu.pipeline_mode<synchronous>, transform_indices = @transform_2, window_bounds = array<i64: 8, 5>}, {pipeline_mode = #tpu.pipeline_mode<synchronous>, transform_indices = @transform_3, window_bounds = array<i64: 1, 384>}, {pipeline_mode = #tpu.pipeline_mode<synchronous>, transform_indices = @transform_4, window_bounds = array<i64: 8, 8>}, {pipeline_mode = #tpu.pipeline_mode<synchronous>, transform_indices = @transform_5, window_bounds = array<i64: 16, 8>}, {pipeline_mode = #tpu.pipeline_mode<synchronous>, transform_indices = @transform_6, window_bounds = array<i64: 16, 1>}, {pipeline_mode = #tpu.pipeline_mode<synchronous>, transform_indices = @transform_7, window_bounds = array<i64: 8, 16>}, {pipeline_mode = #tpu.pipeline_mode<synchronous>, transform_indices = @transform_8, window_bounds = array<i64: 8, 8>}, {pipeline_mode = #tpu.pipeline_mode<synchronous>, transform_indices = @transform_9, window_bounds = array<i64: 8, 1>}, {transform_indices = @transform_10, window_bounds = array<i64: 1, 8, 384>}]} {
    %cst = arith.constant 0.000000e+00 : f32
    %0 = vector.broadcast %cst : f32 to vector<8x384xf32>
    %c0 = arith.constant 0 : index
    %c0_0 = arith.constant 0 : index
    %c0_1 = arith.constant 0 : index
    %1 = vector.load %arg1[%c0, %c0_0, %c0_1] : memref<1x8x512xf32, #tpu.memory_space<vmem>>, vector<1x8x384xf32>
    %2 = vector.shape_cast %1 : vector<1x8x384xf32> to vector<8x384xf32>
    %c0_2 = arith.constant 0 : index
    %c0_3 = arith.constant 0 : index
    %3 = vector.load %arg2[%c0_2, %c0_3] : memref<8x9xf32, #tpu.memory_space<vmem>>, vector<8x1xf32>
    %4 = vector.broadcast %3 : vector<8x1xf32> to vector<8x384xf32>
    %5 = arith.mulf %2, %4 : vector<8x384xf32>
    %6 = arith.addf %0, %5 : vector<8x384xf32>
    %c383_i32 = arith.constant 383 : i32
    %7 = tpu.dynamic_rotate %2 by %c383_i32 dim 1 : vector<8x384xf32>, i32 -> vector<8x384xf32>
    %c0_4 = arith.constant 0 : index
    %c1 = arith.constant 1 : index
    %8 = vector.load %arg2[%c0_4, %c1] : memref<8x9xf32, #tpu.memory_space<vmem>>, vector<8x1xf32>
    %9 = vector.broadcast %8 : vector<8x1xf32> to vector<8x384xf32>
    %10 = arith.mulf %7, %9 : vector<8x384xf32>
    %11 = arith.addf %6, %10 : vector<8x384xf32>
    %c382_i32 = arith.constant 382 : i32
    %12 = tpu.dynamic_rotate %2 by %c382_i32 dim 1 : vector<8x384xf32>, i32 -> vector<8x384xf32>
    %c0_5 = arith.constant 0 : index
    %c2 = arith.constant 2 : index
    %13 = vector.load %arg2[%c0_5, %c2] : memref<8x9xf32, #tpu.memory_space<vmem>>, vector<8x1xf32>
    %14 = vector.broadcast %13 : vector<8x1xf32> to vector<8x384xf32>
    %15 = arith.mulf %12, %14 : vector<8x384xf32>
    %16 = arith.addf %11, %15 : vector<8x384xf32>
    %c0_6 = arith.constant 0 : index
    %c0_7 = arith.constant 0 : index
    %c18 = arith.constant 18 : index
    %17 = vector.load %arg1[%c0_6, %c0_7, %c18] : memref<1x8x512xf32, #tpu.memory_space<vmem>>, vector<1x8x384xf32>
    %18 = vector.shape_cast %17 : vector<1x8x384xf32> to vector<8x384xf32>
    %c0_8 = arith.constant 0 : index
    %c3 = arith.constant 3 : index
    %19 = vector.load %arg2[%c0_8, %c3] : memref<8x9xf32, #tpu.memory_space<vmem>>, vector<8x1xf32>
    %20 = vector.broadcast %19 : vector<8x1xf32> to vector<8x384xf32>
    %21 = arith.mulf %18, %20 : vector<8x384xf32>
    %22 = arith.addf %16, %21 : vector<8x384xf32>
    %c383_i32_9 = arith.constant 383 : i32
    %23 = tpu.dynamic_rotate %18 by %c383_i32_9 dim 1 : vector<8x384xf32>, i32 -> vector<8x384xf32>
    %c0_10 = arith.constant 0 : index
    %c4 = arith.constant 4 : index
    %24 = vector.load %arg2[%c0_10, %c4] : memref<8x9xf32, #tpu.memory_space<vmem>>, vector<8x1xf32>
    %25 = vector.broadcast %24 : vector<8x1xf32> to vector<8x384xf32>
    %26 = arith.mulf %23, %25 : vector<8x384xf32>
    %27 = arith.addf %22, %26 : vector<8x384xf32>
    %c382_i32_11 = arith.constant 382 : i32
    %28 = tpu.dynamic_rotate %18 by %c382_i32_11 dim 1 : vector<8x384xf32>, i32 -> vector<8x384xf32>
    %c0_12 = arith.constant 0 : index
    %c5 = arith.constant 5 : index
    %29 = vector.load %arg2[%c0_12, %c5] : memref<8x9xf32, #tpu.memory_space<vmem>>, vector<8x1xf32>
    %30 = vector.broadcast %29 : vector<8x1xf32> to vector<8x384xf32>
    %31 = arith.mulf %28, %30 : vector<8x384xf32>
    %32 = arith.addf %27, %31 : vector<8x384xf32>
    %c0_13 = arith.constant 0 : index
    %c0_14 = arith.constant 0 : index
    %c36 = arith.constant 36 : index
    %33 = vector.load %arg1[%c0_13, %c0_14, %c36] : memref<1x8x512xf32, #tpu.memory_space<vmem>>, vector<1x8x384xf32>
    %34 = vector.shape_cast %33 : vector<1x8x384xf32> to vector<8x384xf32>
    %c0_15 = arith.constant 0 : index
    %c6 = arith.constant 6 : index
    %35 = vector.load %arg2[%c0_15, %c6] : memref<8x9xf32, #tpu.memory_space<vmem>>, vector<8x1xf32>
    %36 = vector.broadcast %35 : vector<8x1xf32> to vector<8x384xf32>
    %37 = arith.mulf %34, %36 : vector<8x384xf32>
    %38 = arith.addf %32, %37 : vector<8x384xf32>
    %c383_i32_16 = arith.constant 383 : i32
    %39 = tpu.dynamic_rotate %34 by %c383_i32_16 dim 1 : vector<8x384xf32>, i32 -> vector<8x384xf32>
    %c0_17 = arith.constant 0 : index
    %c7 = arith.constant 7 : index
    %40 = vector.load %arg2[%c0_17, %c7] : memref<8x9xf32, #tpu.memory_space<vmem>>, vector<8x1xf32>
    %41 = vector.broadcast %40 : vector<8x1xf32> to vector<8x384xf32>
    %42 = arith.mulf %39, %41 : vector<8x384xf32>
    %43 = arith.addf %38, %42 : vector<8x384xf32>
    %c382_i32_18 = arith.constant 382 : i32
    %44 = tpu.dynamic_rotate %34 by %c382_i32_18 dim 1 : vector<8x384xf32>, i32 -> vector<8x384xf32>
    %c0_19 = arith.constant 0 : index
    %c8 = arith.constant 8 : index
    %45 = vector.load %arg2[%c0_19, %c8] : memref<8x9xf32, #tpu.memory_space<vmem>>, vector<8x1xf32>
    %46 = vector.broadcast %45 : vector<8x1xf32> to vector<8x384xf32>
    %47 = arith.mulf %44, %46 : vector<8x384xf32>
    %48 = arith.addf %43, %47 : vector<8x384xf32>
    %c0_20 = arith.constant 0 : index
    %c0_21 = arith.constant 0 : index
    %49 = vector.load %arg3[%c0_20, %c0_21] : memref<8x5xf32, #tpu.memory_space<vmem>>, vector<8x1xf32>
    %c0_22 = arith.constant 0 : index
    %c1_23 = arith.constant 1 : index
    %50 = vector.load %arg3[%c0_22, %c1_23] : memref<8x5xf32, #tpu.memory_space<vmem>>, vector<8x1xf32>
    %c0_24 = arith.constant 0 : index
    %c2_25 = arith.constant 2 : index
    %51 = vector.load %arg3[%c0_24, %c2_25] : memref<8x5xf32, #tpu.memory_space<vmem>>, vector<8x1xf32>
    %c0_26 = arith.constant 0 : index
    %c3_27 = arith.constant 3 : index
    %52 = vector.load %arg3[%c0_26, %c3_27] : memref<8x5xf32, #tpu.memory_space<vmem>>, vector<8x1xf32>
    %c0_28 = arith.constant 0 : index
    %c4_29 = arith.constant 4 : index
    %53 = vector.load %arg3[%c0_28, %c4_29] : memref<8x5xf32, #tpu.memory_space<vmem>>, vector<8x1xf32>
    %54 = vector.broadcast %49 : vector<8x1xf32> to vector<8x384xf32>
    %55 = arith.addf %48, %54 : vector<8x384xf32>
    %cst_30 = arith.constant 0.000000e+00 : f32
    %56 = vector.broadcast %cst_30 : f32 to vector<8x384xf32>
    %57 = arith.maximumf %55, %56 : vector<8x384xf32>
    %c0_31 = arith.constant 0 : index
    %c0_32 = arith.constant 0 : index
    %58 = vector.load %arg5[%c0_31, %c0_32] : memref<8x8xf32, #tpu.memory_space<vmem>>, vector<8x8xf32>
    %cst_33 = arith.constant dense<0.000000e+00> : vector<8x384xf32>
    %59 = tpu.matmul %58, %57, %cst_33 {dimension_numbers = #tpu.dot_dimension_numbers<[1], [0], [0], [1], [0, 0, 1, 1], [], []>} : vector<8x8xf32>, vector<8x384xf32>, vector<8x384xf32> -> vector<8x384xf32>
    %60 = vector.broadcast %50 : vector<8x1xf32> to vector<8x384xf32>
    %61 = arith.addf %59, %60 : vector<8x384xf32>
    %cst_34 = arith.constant 0.000000e+00 : f32
    %62 = vector.broadcast %cst_34 : f32 to vector<8x384xf32>
    %63 = arith.maximumf %61, %62 : vector<8x384xf32>
    %64 = vector.broadcast %51 : vector<8x1xf32> to vector<8x384xf32>
    %65 = arith.mulf %63, %64 : vector<8x384xf32>
    %66 = vector.broadcast %52 : vector<8x1xf32> to vector<8x384xf32>
    %67 = arith.addf %65, %66 : vector<8x384xf32>
    %68 = arith.negf %67 : vector<8x384xf32>
    %69 = math.exp %68 : vector<8x384xf32>
    %cst_35 = arith.constant 1.000000e+00 : f32
    %70 = vector.broadcast %cst_35 : f32 to vector<8x384xf32>
    %71 = arith.addf %70, %69 : vector<8x384xf32>
    %72 = arith.divf %70, %71 : vector<8x384xf32>
    %73 = arith.addf %67, %72 : vector<8x384xf32>
    %c0_36 = arith.constant 0 : index
    %c0_37 = arith.constant 0 : index
    %74 = vector.load %arg4[%c0_36, %c0_37] : memref<1x384xf32, #tpu.memory_space<vmem>>, vector<1x384xf32>
    %75 = vector.broadcast %74 : vector<1x384xf32> to vector<8x384xf32>
    %76 = arith.mulf %73, %75 : vector<8x384xf32>
    %cst_38 = arith.constant dense<0.000000e+00> : vector<8xf32>
    %77 = vector.multi_reduction <add>, %76, %cst_38 [1] : vector<8x384xf32> to vector<8xf32>
    %78 = vector.shape_cast %77 : vector<8xf32> to vector<8x1xf32>
    %c0_39 = arith.constant 0 : index
    %c0_40 = arith.constant 0 : index
    %79 = vector.load %arg6[%c0_39, %c0_40] : memref<16x8xf32, #tpu.memory_space<vmem>>, vector<16x8xf32>
    %cst_41 = arith.constant dense<0.000000e+00> : vector<16x1xf32>
    %80 = tpu.matmul %79, %78, %cst_41 {dimension_numbers = #tpu.dot_dimension_numbers<[1], [0], [0], [1], [0, 0, 1, 1], [], []>} : vector<16x8xf32>, vector<8x1xf32>, vector<16x1xf32> -> vector<16x1xf32>
    %c0_42 = arith.constant 0 : index
    %c0_43 = arith.constant 0 : index
    %81 = vector.load %arg7[%c0_42, %c0_43] : memref<16x1xf32, #tpu.memory_space<vmem>>, vector<16x1xf32>
    %82 = arith.addf %80, %81 : vector<16x1xf32>
    %83 = arith.negf %82 : vector<16x1xf32>
    %84 = math.exp %83 : vector<16x1xf32>
    %cst_44 = arith.constant 1.000000e+00 : f32
    %85 = vector.broadcast %cst_44 : f32 to vector<16x1xf32>
    %86 = arith.addf %85, %84 : vector<16x1xf32>
    %87 = arith.divf %85, %86 : vector<16x1xf32>
    %88 = arith.addf %82, %87 : vector<16x1xf32>
    %c0_45 = arith.constant 0 : index
    %c0_46 = arith.constant 0 : index
    %89 = vector.load %arg8[%c0_45, %c0_46] : memref<8x16xf32, #tpu.memory_space<vmem>>, vector<8x16xf32>
    %cst_47 = arith.constant dense<0.000000e+00> : vector<8x1xf32>
    %90 = tpu.matmul %89, %88, %cst_47 {dimension_numbers = #tpu.dot_dimension_numbers<[1], [0], [0], [1], [0, 0, 1, 1], [], []>} : vector<8x16xf32>, vector<16x1xf32>, vector<8x1xf32> -> vector<8x1xf32>
    %91 = arith.addf %90, %53 : vector<8x1xf32>
    %92 = arith.negf %91 : vector<8x1xf32>
    %93 = math.exp %92 : vector<8x1xf32>
    %cst_48 = arith.constant 1.000000e+00 : f32
    %94 = vector.broadcast %cst_48 : f32 to vector<8x1xf32>
    %95 = arith.addf %94, %93 : vector<8x1xf32>
    %96 = arith.divf %94, %95 : vector<8x1xf32>
    %97 = vector.broadcast %96 : vector<8x1xf32> to vector<8x384xf32>
    %98 = arith.mulf %73, %97 : vector<8x384xf32>
    %c0_49 = arith.constant 0 : index
    %c0_50 = arith.constant 0 : index
    %99 = vector.load %arg9[%c0_49, %c0_50] : memref<8x8xf32, #tpu.memory_space<vmem>>, vector<8x8xf32>
    %cst_51 = arith.constant dense<0.000000e+00> : vector<8x384xf32>
    %100 = tpu.matmul %99, %98, %cst_51 {dimension_numbers = #tpu.dot_dimension_numbers<[1], [0], [0], [1], [0, 0, 1, 1], [], []>} : vector<8x8xf32>, vector<8x384xf32>, vector<8x384xf32> -> vector<8x384xf32>
    %c0_52 = arith.constant 0 : index
    %c0_53 = arith.constant 0 : index
    %101 = vector.load %arg10[%c0_52, %c0_53] : memref<8x1xf32, #tpu.memory_space<vmem>>, vector<8x1xf32>
    %102 = vector.broadcast %101 : vector<8x1xf32> to vector<8x384xf32>
    %103 = arith.addf %100, %102 : vector<8x384xf32>
    %c0_54 = arith.constant 0 : index
    %c0_55 = arith.constant 0 : index
    %c0_56 = arith.constant 0 : index
    %104 = vector.load %arg11[%c0_54, %c0_55, %c0_56] : memref<1x8x384xf32, #tpu.memory_space<vmem>>, vector<1x8x384xf32>
    %105 = vector.shape_cast %104 : vector<1x8x384xf32> to vector<8x384xf32>
    %106 = vector.shape_cast %103 : vector<8x384xf32> to vector<1x8x384xf32>
    tpu.vector_store %arg11[%c0_54, %c0_55, %c0_56], %106 {strides = array<i32>} : memref<1x8x384xf32, #tpu.memory_space<vmem>>, vector<1x8x384xf32>,
    return
  }
  func.func @transform_0(%arg0: i32) -> (i32, i32, i32) {
    %c0_i32 = arith.constant 0 : i32
    %c0_i32_0 = arith.constant 0 : i32
    %c0_i32_1 = arith.constant 0 : i32
    return %arg0, %c0_i32, %c0_i32_0 : i32, i32, i32
  }
  func.func @transform_1(%arg0: i32) -> (i32, i32) {
    %c0_i32 = arith.constant 0 : i32
    %c0_i32_0 = arith.constant 0 : i32
    %c0_i32_1 = arith.constant 0 : i32
    return %c0_i32, %c0_i32_0 : i32, i32
  }
  func.func @transform_2(%arg0: i32) -> (i32, i32) {
    %c0_i32 = arith.constant 0 : i32
    %c0_i32_0 = arith.constant 0 : i32
    %c0_i32_1 = arith.constant 0 : i32
    return %c0_i32, %c0_i32_0 : i32, i32
  }
  func.func @transform_3(%arg0: i32) -> (i32, i32) {
    %c0_i32 = arith.constant 0 : i32
    %c0_i32_0 = arith.constant 0 : i32
    %c0_i32_1 = arith.constant 0 : i32
    return %c0_i32, %c0_i32_0 : i32, i32
  }
  func.func @transform_4(%arg0: i32) -> (i32, i32) {
    %c0_i32 = arith.constant 0 : i32
    %c0_i32_0 = arith.constant 0 : i32
    %c0_i32_1 = arith.constant 0 : i32
    return %c0_i32, %c0_i32_0 : i32, i32
  }
  func.func @transform_5(%arg0: i32) -> (i32, i32) {
    %c0_i32 = arith.constant 0 : i32
    %c0_i32_0 = arith.constant 0 : i32
    %c0_i32_1 = arith.constant 0 : i32
    return %c0_i32, %c0_i32_0 : i32, i32
  }
  func.func @transform_6(%arg0: i32) -> (i32, i32) {
    %c0_i32 = arith.constant 0 : i32
    %c0_i32_0 = arith.constant 0 : i32
    %c0_i32_1 = arith.constant 0 : i32
    return %c0_i32, %c0_i32_0 : i32, i32
  }
  func.func @transform_7(%arg0: i32) -> (i32, i32) {
    %c0_i32 = arith.constant 0 : i32
    %c0_i32_0 = arith.constant 0 : i32
    %c0_i32_1 = arith.constant 0 : i32
    return %c0_i32, %c0_i32_0 : i32, i32
  }
  func.func @transform_8(%arg0: i32) -> (i32, i32) {
    %c0_i32 = arith.constant 0 : i32
    %c0_i32_0 = arith.constant 0 : i32
    %c0_i32_1 = arith.constant 0 : i32
    return %c0_i32, %c0_i32_0 : i32, i32
  }
  func.func @transform_9(%arg0: i32) -> (i32, i32) {
    %c0_i32 = arith.constant 0 : i32
    %c0_i32_0 = arith.constant 0 : i32
    %c0_i32_1 = arith.constant 0 : i32
    return %c0_i32, %c0_i32_0 : i32, i32
  }
  func.func @transform_10(%arg0: i32) -> (i32, i32, i32) {
    %c0_i32 = arith.constant 0 : i32
    %c0_i32_0 = arith.constant 0 : i32
    %c0_i32_1 = arith.constant 0 : i32
    return %arg0, %c0_i32, %c0_i32_0 : i32, i32, i32
  }
}

</mosaic_0001>

<bundles_post_ra>
// kernel: tpu_custom_call.1
= control target key start
LH: loop header
LB: loop body
LE: loop exit
PB: predicated region body
PF: predicated region fallthrough
CT: control target
= control target key end

     0   :  { %15 = vsyncpa [#allocation3], 0  ;;  %s1992_s0 = inlined_call_operand.hbm [shape: f32[2,8,512], index: 0, kind: input, shape index: {}]   ;;  %s1993_s1 = inlined_call_operand.vmem [shape: f32[8,9], index: 1, kind: input, shape index: {}]   ;;  %s1994_s2 = inlined_call_operand.vmem [shape: f32[8,5], index: 2, kind: input, shape index: {}]   ;;  %s1995_s3 = inlined_call_operand.vmem [shape: f32[1,384], index: 3, kind: input, shape index: {}]   ;;  %s1996_s4 = inlined_call_operand.vmem [shape: f32[8,8], index: 4, kind: input, shape index: {}]   ;;  %s1997_s5 = inlined_call_operand.vmem [shape: f32[16,8], index: 5, kind: input, shape index: {}]   ;;  %s1998_s6 = inlined_call_operand.vmem [shape: f32[16,1], index: 6, kind: input, shape index: {}]   ;;  %s1999_s7 = inlined_call_operand.vmem [shape: f32[8,16], index: 7, kind: input, shape index: {}]   ;;  %s2000_s8 = inlined_call_operand.vmem [shape: f32[8,8], index: 8, kind: input, shape index: {}]   ;;  %s2001_s9 = inlined_call_operand.vmem [shape: f32[8,1], index: 9, kind: input, shape index: {}]   ;;  %s2002_s10 = inlined_call_operand.hbm [shape: f32[2,8,384], index: 10, kind: output, shape index: {}]  }
   0x1   :  { %17 = vsyncpa [#allocation3 + $0x1], 0 }
   0x2   :  { %18 = vsyncpa [#allocation4], 0 }
   0x3   :  { %20 = vsyncpa [#allocation4 + $0x1], 0  ;;  %s1594_s13 = smov 0   ;;  %s1596_s14 = smov 0  }
   0x4   :  { %s1598_s15 = smov 0   ;;  %s1600_s16 = smov 0  }
   0x5 LB: > { %s1615_s17 = sadd.s32 4294967295, %s1518_s16   ;;  %s1259_s18 = sadd.s32 4294967294, %s1518_s16   ;;  %s1518_s16 = sphi %s1600_s16, %s2019_s16   ;;  %s1514_s15 = sphi %s1598_s15, %s2018_s15   ;;  %s1510_s14 = sphi %s1596_s14, %s2017_s14   ;;  %s1506_s13 = sphi %s1594_s13, %s2016_s13  }
   0x6   : > { %s1619_s19 = sadd.s32 1, %s1518_s16   ;;  %s33_s20 = sadd.s32 1, %s1514_s15 }
   0x7   : > { %s30_s21 = ssub.s32 %s1518_s16, %s1619_s19  ;;  %p40_p0 = scmp.ne.s32.totalorder %s1514_s15, %s1510_s14 }
   0x8   : > { %p31_p1 = scmp.eq.s32.totalorder %s30_s21, 0  ;;  %p41_p2 = scmp.eq.s32.totalorder %s1518_s16, 0 }
   0x9   : > { %p46_p3 = scmp.ne.s32.totalorder %s1510_s14, %s1506_s13  ;;  %p47_p4 = scmp.eq.s32.totalorder %s1615_s17, 0 }
   0xa   : > { %s1631_s22 = scalar_select %p31_p1, %s1514_s15, %s33_s20  }
   0xb   : > { %p1633_p5 = por %p41_p2, %p40_p0  ;;  %p1637_p6 = por %p47_p4, %p46_p3 }
   0xc   : > { %2004 = sst [smem:[#allocation8_spill]] %s1631_s22  ;;  %p259_p7 = scmp.eq.s32.totalorder %s1615_s17, 1 }
   0xd   : > { %p265_p8 = scmp.eq.s32.totalorder %s1259_s18, 1  ;;  %p1333_p10 = scmp.lt.s32.totalorder %s1518_s16, 2 }
   0xe   : > { %p1644_p11 = por %p259_p7, %p40_p0  ;;  %s312_s27 = sand.u32 1, %s1514_s15  }
   0xf   : > { %p1648_p12 = por %p265_p8, %p46_p3  ;;  %s1283_s28 = sshll.u32 %s1518_s16, 9 }
  0x10   : > { %s2007_s25 = scalar_select %p1644_p11, 1, 0 }
  0x11   : > { %s2008_s26 = scalar_select %p1648_p12, 1, 0 }
  0x12   : > { %s1262_s29 = sshll.u32 %s312_s27, 5  ;;  %s1657_s12 = scalar_lea.hbm %s1992_s0, %s1283_s28 }
  0x13   : > { %s316_s18 = scalar_lea.vmem [#allocation2], %s1262_s29  ;;  %p1661_p13 = pnand %p1333_p10, %p1633_p5 }
  0x14   : > { %s324_s20 = sshll.u32 %s316_s18, 4  ;;  %s313_s30 = scalar_lea.sflag [#allocation3], %s312_s27  ;;  %s1665_s20 = int_to_ptr.vmem [resolvable:$true] %s324_s20 }
  0x15   : > { %s1422_s28 = scalar_lea.hbm %s1657_s12, 512  ;;  %p1424_p3 = pneg %p1661_p13 }
  0x16   : > { %p1423_p2 = scmp.ne.s32.totalorder %s1657_s12, %s1422_s28  ;;  %s1427_s11 = scalar_lea.hbm %s1992_s0, 1024 }
  0x17   : > { %p1428_p5 = scmp.lt.u32.totalorder %s1657_s12, %s1992_s0  ;;  %p1429_p8 = scmp.lt.u32.totalorder %s1427_s11, %s1422_s28 }
  0x18   : > { %p1425_p4 = pnand %p1424_p3, %p1423_p2  ;;  %p1431_p9 = scmp.lt.u32.totalorder %s1422_s28, %s1657_s12 }
  0x19   : > { %p1430_p10 = por %p1429_p8, %p1428_p5 }
  0x1a   : > { %p1426_p7 = pneg %p1425_p4 }
  0x1b   : > { %p1432_p0 = por %p1431_p9, %p1430_p10 }
  0x1d   : > { %p1433_p1 = pnand %p1432_p0, %p1426_p7 }
  0x1f   : > { %1436 = shalt.err (!%p1433_p1)
}
  0x20   : > { %s1437_s27 = scalar_lea.vmem %s1665_s20, 512  ;;  %s1520_s23 = smov [#allocation2]  }
  0x21   : > { %p1438_p2 = scmp.ne.s32.totalorder %s1665_s20, %s1437_s27  ;;  %s1442_s29 = sshll.u32 %s1520_s23, 4  ;;  %s1443_s29 = int_to_ptr.vmem [resolvable:$false] %s1442_s29 }
  0x22   : > { %s1444_s22 = scalar_lea.vmem %s1443_s29, 1024  ;;  %p1445_p11 = scmp.lt.s32.totalorder %s1665_s20, %s1443_s29 }
  0x23   : > { %p1440_p4 = pnand %p1438_p2, %p1424_p3  ;;  %p1446_p5 = scmp.lt.s32.totalorder %s1444_s22, %s1437_s27 }
  0x25   : > { %p1441_p12 = pneg %p1440_p4  ;;  %p1447_p8 = por %p1446_p5, %p1445_p11 }
  0x27   : > { %p1448_p9 = pnand %p1447_p8, %p1441_p12 }
  0x29   : > { %1451 = shalt.err (!%p1448_p9)
}
  0x2a   : > { %1328 = dma.hbm_to_vmem [thread:$0]  (!%p1661_p13), %s1657_s12, 512, %s1665_s20, %s313_s30  }
  0x2b   : > { %p2010_p0 = scmp.lt.s32.totalorder %s1518_s16, 3  ;;  %p2011_p1 = scmp.ge.s32.totalorder %s1518_s16, 1 }
  0x2d   : > { %p330_p3 = pnand %p2011_p1, %p2010_p0 }
  0x2e   : > { %s1699_s28 = sand.u32 (!%p330_p3), 1, %s1510_s14  }
  0x2f   : > { %333 = sbr.rel (%p330_p3) target bundleno = 1607 (0x647), region = 60  ;;  %s1266_s11 = sshll.u32 (!%p330_p3), %s1699_s28, 5 }
  0x30   : > { %s336_s18 = scalar_lea.sflag (!%p330_p3), [#allocation3], %s1699_s28  ;;  %s339_s27 = scalar_lea.vmem (!%p330_p3), [#allocation2], %s1266_s11 }
  0x36   : > { %1497 = dma.done.wait (%p1637_p6), %s336_s18, 512  }
  0x37   : > { %1499 = vsyncadd (%p1637_p6), %s336_s18, 4294966784  ;;  %v1521_v0 = vmov 3   ;;  %v1522_v1 = vmov 0   ;;  %v1709_v2 = vld [vmem:[%s339_s27 + $0x8] sm:$0xff]  ;;  %v379_v3 = vld [vmem:[%s1993_s1] sm:$0xff]  ;;  %s1523_s21 = smov 110   ;;  %v397_v58 = vlaneseq }
  0x38   : > { %1384 = vset.pattern.permute.xlu0 %v1521_v0  ;;  %1386 = vset.pattern.permute.xlu1 %v1522_v1  ;;  %v1716_v4 = vld [vmem:[%s339_s27 + $0x10] sm:$0xff]  ;;  %v1524_v5 = vmov 6   ;;  %v1720_v6 = vld [vmem:[%s339_s27 + $0x18] sm:$0xff]  ;;  %v1722_v7 = vld [vmem:[%s339_s27] sm:$0xff]  ;;  %v1525_v8 = vmov 8   ;;  %s1526_s24 = smov 92  }
  0x39   : > { %473 = vrot.lane.b32.xlu1 %v1709_v2, %s1523_s21  ;;  %438 = vperm.xlu0 %1384, %v379_v3   ;;  %s1527_s30 = smov 127   ;;  %v1528_v9 = vmov 2   ;;  %s1529_s23 = smov 126   ;;  %v1530_v10 = vmov 4   ;;  %v1531_v11 = vmov 5   ;;  %v1751_v12 = vld [vmem:[%s1994_s2] sm:$0xff] }
  0x3a   : > { %v1532_v13 = vmov 7   ;;  %v1533_v14 = vmov 1   ;;  %vm457_vm0 = vcmask 900096   ;;  %vm543_vm1 = vcmask 752640   ;;  %s1320_s29 = smul.u32 384, %s1615_s17  ;;  %s1175_s17 = scalar_lea.sflag [#allocation4], %s1699_s28 }
  0x3b   : > { %v1534_v38 = vmov 0.0   ;;  %vm1535_vm2 = vmmov 0   ;;  %v1814_v61 = vand.u32 127, %v397_v58  ;;  %vm622_vm5 = vcmask 64512   ;;  %p2012_p11 = scmp.ne.s32.totalorder %s2007_s25, 0 }
  0x3c   : > { %690 = vmatprep.mubr.f32.mxu0 %v1534_v38  ;;  %1294 = vmatprep.subr.mxu1 %v1534_v38  ;;  %vm932_vm6 = vcmask 130048   ;;  %s1948_s12 = scalar_lea.hbm %s2002_s10, %s1320_s29 }
  0x3d   : > { %475 = vrot.lane.b32.xlu1 %v1716_v4, %s1523_s21  ;;  %1385 = vset.pattern.permute.xlu0 %v1524_v5  ;;  %vm399_vm3 = vcmp.lt.s32.totalorder %v1814_v61, 127  ;;  %vm419_vm4 = vcmp.lt.s32.totalorder %v1814_v61, 126 }
  0x3e   : > { %524 = vperm.xlu0 %1385, %v379_v3   ;;  %1296 = vmatprep.mubr.msk.f32.mxu1 %vm1535_vm2, %v1534_v38 }
  0x41   : > { %477 = vrot.lane.b32.xlu1 %v1720_v6, %s1523_s21 }
  0x42   : > { %471 = vrot.lane.b32.xlu0 %v1722_v7, %s1523_s21 }
  0x43   : > { %1391 = vset.pattern.permute.xlu0 %v1525_v8 }
  0x45   : > { %555 = vrot.lane.b32.xlu1 %v1709_v2, %s1526_s24 }
  0x46   : > { %557 = vrot.lane.b32.xlu0 %v1716_v4, %s1526_s24 }
  0x49   : > { %559 = vrot.lane.b32.xlu1 %v1720_v6, %s1526_s24 }
  0x4a   : > { %553 = vrot.lane.b32.xlu0 %v1722_v7, %s1526_s24 }
  0x4d   : > { %382 = vperm.xlu1 %1386, %v379_v3  }
  0x4e   : > { %395 = vrot.lane.b32.xlu0 %v1716_v4, %s1527_s30 }
  0x51   : > { %1387 = vset.pattern.permute.xlu1 %v1528_v9 }
  0x52   : > { %391 = vrot.lane.b32.xlu0 %v1722_v7, %s1527_s30  ;;  %424 = vperm.xlu1 %1387, %v379_v3  }
  0x56   : > { %417 = vrot.lane.b32.xlu0 %v1716_v4, %s1529_s23  ;;  %393 = vrot.lane.b32.xlu1 %v1709_v2, %s1527_s30 }
  0x57   : > { %1388 = vset.pattern.permute.xlu1 %v1530_v10 }
  0x5a   : > { %413 = vrot.lane.b32.xlu0 %v1722_v7, %s1529_s23  ;;  %495 = vperm.xlu1 %1388, %v379_v3  }
  0x5e   : > { %596 = vperm.xlu0 %1391, %v379_v3   ;;  %415 = vrot.lane.b32.xlu1 %v1709_v2, %s1529_s23 }
  0x5f   : > { %1389 = vset.pattern.permute.xlu1 %v1531_v11 }
  0x62   : > { %1392 = vset.pattern.permute.xlu0 %v1522_v1  ;;  %514 = vperm.xlu1 %1389, %v379_v3  }
  0x63   : > { %608 = vperm.xlu0 %1392, %v1751_v12  }
  0x66   : > { %1390 = vset.pattern.permute.xlu1 %v1532_v13 }
  0x67   : > { %1393 = vset.pattern.permute.xlu0 %v1533_v14  ;;  %577 = vperm.xlu1 %1390, %v379_v3  }
  0x68   : > { %404 = vperm.xlu0 %1393, %v379_v3  }
  0x6b   : > { %1394 = vset.pattern.permute.xlu1 %v1528_v9 }
  0xab   : > { %v474_v15 = vpop.permute.xlu1 %473 }
  0xaf   : > { %v476_v16 = vpop.permute.xlu1 %475 }
  0xb0   : > { %v480_v17 = vsel %vm457_vm0, %v474_v15, %v476_v16 }
  0xb1   : > { %487 = vrot.lane.b32.xlu1 %v480_v17, %s1527_s30 }
  0xb3   : > { %v478_v18 = vpop.permute.xlu1 %477 }
  0xb4   : > { %v481_v19 = vsel %vm457_vm0, %v476_v16, %v478_v18 }
  0xb5   : > { %489 = vrot.lane.b32.xlu0 %v481_v19, %s1527_s30 }
  0xb7   : > { %v556_v24 = vpop.permute.xlu1 %555 }
  0xb8   : > { %v439_v20 = vpop.permute.xlu0 %438 }
  0xb9   : > { %506 = vrot.lane.b32.xlu0 %v480_v17, %s1529_s23  ;;  %v443_v29 = vmul.f32 %v439_v20, %v1716_v4  ;;  %v441_v31 = vmul.f32 %v439_v20, %v1722_v7  ;;  %v442_v34 = vmul.f32 %v439_v20, %v1709_v2  ;;  %v444_v35 = vmul.f32 %v439_v20, %v1720_v6 }
  0xbb   : > { %v560_v27 = vpop.permute.xlu1 %559 }
  0xbd   : > { %v525_v21 = vpop.permute.xlu0 %524 }
  0xbe   : > { %v528_v33 = vmul.f32 %v525_v21, %v1709_v2  ;;  %v529_v36 = vmul.f32 %v525_v21, %v1716_v4  ;;  %v527_v37 = vmul.f32 %v525_v21, %v1722_v7  ;;  %v530_v39 = vmul.f32 %v525_v21, %v1720_v6 }
  0xc1   : > { %v472_v22 = vpop.permute.xlu0 %471 }
  0xc2   : > { %v479_v23 = vsel %vm457_vm0, %v472_v22, %v474_v15 }
  0xc3   : > { %485 = vrot.lane.b32.xlu1 %v479_v23, %s1527_s30 }
  0xc5   : > { %v558_v25 = vpop.permute.xlu0 %557 }
  0xc6   : > { %v562_v26 = vsel %vm543_vm1, %v556_v24, %v558_v25  ;;  %v563_v28 = vsel %vm543_vm1, %v558_v25, %v560_v27 }
  0xc7   : > { %508 = vrot.lane.b32.xlu1 %v481_v19, %s1529_s23  ;;  %569 = vrot.lane.b32.xlu0 %v562_v26, %s1527_s30 }
  0xc9   : > { %v554_v30 = vpop.permute.xlu0 %553 }
  0xca   : > { %v561_v32 = vsel %vm543_vm1, %v554_v30, %v556_v24 }
  0xcb   : > { %504 = vrot.lane.b32.xlu1 %v479_v23, %s1529_s23  ;;  %588 = vrot.lane.b32.xlu0 %v562_v26, %s1529_s23 }
  0xcc   : > { %v383_v41 = vpop.permute.xlu1 %382 }
  0xcd   : > { %v396_v40 = vpop.permute.xlu0 %395  ;;  %v386_v5 = vmul.f32 %v1709_v2, %v383_v41  ;;  %v385_v11 = vmul.f32 %v1722_v7, %v383_v41  ;;  %v387_v2 = vmul.f32 %v1716_v4, %v383_v41 }
  0xcf   : > { %571 = vrot.lane.b32.xlu1 %v563_v28, %s1527_s30  ;;  %453 = vrot.lane.b32.xlu0 %v443_v29, %s1523_s21 }
  0xd1   : > { %v392_v42 = vpop.permute.xlu0 %391  ;;  %v425_v43 = vpop.permute.xlu1 %424 }
  0xd2   : > { %v402_v14 = vsel %vm399_vm3, %v396_v40, %v392_v42 }
  0xd3   : > { %567 = vrot.lane.b32.xlu1 %v561_v32, %s1527_s30  ;;  %449 = vrot.lane.b32.xlu0 %v441_v31, %s1523_s21 }
  0xd5   : > { %v418_v44 = vpop.permute.xlu0 %417  ;;  %v394_v45 = vpop.permute.xlu1 %393 }
  0xd6   : > { %v401_v3 = vsel %vm399_vm3, %v392_v42, %v394_v45 }
  0xd7   : > { %590 = vrot.lane.b32.xlu1 %v563_v28, %s1529_s23  ;;  %537 = vrot.lane.b32.xlu0 %v528_v33, %s1526_s24 }
  0xd9   : > { %v414_v46 = vpop.permute.xlu0 %413  ;;  %v1799_v47 = vpop.permute.xlu1 %495 }
  0xda   : > { %v422_v19 = vsel %vm419_vm4, %v418_v44, %v414_v46 }
  0xdb   : > { %451 = vrot.lane.b32.xlu1 %v442_v34, %s1523_s21  ;;  %586 = vrot.lane.b32.xlu0 %v561_v32, %s1529_s23  ;;  %v429_v26 = vmul.f32 %v425_v43, %v422_v19  ;;  %s1537_s23 = smov 124  }
  0xdd   : > { %v1801_v48 = vpop.permute.xlu0 %596  ;;  %v416_v49 = vpop.permute.xlu1 %415 }
  0xde   : > { %v420_v10 = vsel %vm419_vm4, %v416_v49, %v418_v44  ;;  %v421_v15 = vsel %vm419_vm4, %v414_v46, %v416_v49 }
  0xdf   : > { %455 = vrot.lane.b32.xlu1 %v444_v35, %s1523_s21  ;;  %619 = vperm.xlu0 %1393, %v1751_v12   ;;  %v428_v17 = vmul.f32 %v425_v43, %v420_v10  ;;  %v427_v22 = vmul.f32 %v425_v43, %v421_v15  ;;  %s1538_s21 = smov [#allocation5]  }
  0xe1   : > { %v1803_v50 = vpop.permute.xlu1 %514 }
  0xe2   : > { %v1805_v51 = vpop.permute.xlu0 %608 }
  0xe3   : > { %539 = vrot.lane.b32.xlu1 %v529_v36, %s1526_s24  ;;  %1397 = vset.pattern.permute.xlu0 %v1522_v1 }
  0xe6   : > { %v1807_v52 = vpop.permute.xlu1 %577 }
  0xe7   : > { %535 = vrot.lane.b32.xlu1 %v527_v37, %s1526_s24  ;;  %v405_v53 = vpop.permute.xlu0 %404 }
  0xe8   : > { %v407_v13 = vmul.f32 %v405_v53, %v401_v3  ;;  %v409_v20 = vmul.f32 %v405_v53, %v402_v14 }
  0xea   : > { %v410_v21 = vadd.f32 %v407_v13, %v385_v11  ;;  %v412_v29 = vadd.f32 %v409_v20, %v387_v2 }
  0xeb   : > { %541 = vrot.lane.b32.xlu1 %v530_v39, %s1526_s24  ;;  %s1456_s24 = sshll.u32 %s1538_s21, 4  ;;  %s1457_s24 = int_to_ptr.vmem [resolvable:$false] %s1456_s24 }
  0xec   : > { %v430_v30 = vadd.f32 %v427_v22, %v410_v21  ;;  %v432_v42 = vadd.f32 %v429_v26, %v412_v29  ;;  %s1458_s30 = scalar_lea.vmem %s1457_s24, 768 }
  0xef   : > { %771 = vperm.xlu1 %1394, %v1751_v12  }
  0xf3   : > { %1395 = vset.pattern.permute.xlu1 %v1521_v0 }
  0xf4   : > { %778 = vperm.xlu1 %1395, %v1751_v12  }
  0xf8   : > { %1396 = vset.pattern.permute.xlu1 %v1522_v1  ;;  %v400_v1 = vsel %vm399_vm3, %v394_v45, %v396_v40 }
  0xf9   : > { %v408_v6 = vmul.f32 %v405_v53, %v400_v1  ;;  %929 = vrot.lane.b32.xlu1 %v1751_v12, %s1537_s23  ;;  %s1319_s23 = smul.u32 24, %s1699_s28 }
  0xfb   : > { %v411_v16 = vadd.f32 %v408_v6, %v386_v5  ;;  %s375_s22 = scalar_lea.vmem [#allocation5], %s1319_s23 }
  0xfc   : > { %s1189_s11 = sshll.u32 %s375_s22, 4  ;;  %s1950_s11 = int_to_ptr.vmem [resolvable:$true] %s1189_s11 }
  0xfd   : > { %v431_v25 = vadd.f32 %v428_v17, %v411_v16  ;;  %s1452_s20 = scalar_lea.vmem %s1950_s11, 384  ;;  %p1459_p7 = scmp.lt.s32.totalorder %s1950_s11, %s1457_s24 }
  0xfe   : > { %p1453_p6 = scmp.ne.s32.totalorder %s1950_s11, %s1452_s20  ;;  %p1460_p10 = scmp.lt.s32.totalorder %s1458_s30, %s1452_s20 }
 0x100   : > { %p1454_p12 = pnand %p1453_p6, %p2012_p11  ;;  %p1461_p2 = por %p1460_p10, %p1459_p7 }
 0x102   : > { %p1455_p13 = pneg %p1454_p12 }
 0x104   : > { %p1462_p4 = pnand %p1461_p2, %p1455_p13 }
 0x123   : > { %v488_v54 = vpop.permute.xlu1 %487 }
 0x127   : > { %v490_v55 = vpop.permute.xlu0 %489 }
 0x128   : > { %v491_v7 = vsel %vm399_vm3, %v488_v54, %v490_v55 }
 0x129   : > { %v499_v4 = vmul.f32 %v1799_v47, %v491_v7 }
 0x12b   : > { %v507_v56 = vpop.permute.xlu0 %506 }
 0x135   : > { %v486_v57 = vpop.permute.xlu1 %485 }
 0x136   : > { %v492_v32 = vsel %vm399_vm3, %v486_v57, %v488_v54  ;;  %v493_v43 = vsel %vm399_vm3, %v490_v55, %v486_v57 }
 0x137   : > { %v498_v40 = vmul.f32 %v1799_v47, %v492_v32  ;;  %v500_v55 = vmul.f32 %v1799_v47, %v493_v43 }
 0x139   : > { %v1809_v59 = vpop.permute.xlu1 %508  ;;  %v1811_v60 = vpop.permute.xlu0 %569 }
 0x13a   : > { %v510_v33 = vsel %vm419_vm4, %v507_v56, %v1809_v59 }
 0x13b   : > { %v518_v41 = vmul.f32 %v1803_v50, %v510_v33 }
 0x13d   : > { %v505_v62 = vpop.permute.xlu1 %504  ;;  %v1817_v63 = vpop.permute.xlu0 %588 }
 0x13e   : > { %v511_v44 = vsel %vm419_vm4, %v505_v62, %v507_v56 }
 0x13f   : > { %v517_v57 = vmul.f32 %v1803_v50, %v511_v44 }
 0x141   : > { %v1819_v0 = vpop.permute.xlu1 %571  ;;  %v454_v8 = vpop.permute.xlu0 %453 }
 0x142   : > { %v573_v45 = vsel %vm399_vm3, %v1811_v60, %v1819_v0 }
 0x143   : > { %v581_v56 = vmul.f32 %v1807_v52, %v573_v45 }
 0x145   : > { %v1827_v9 = vpop.permute.xlu1 %567  ;;  %v450_v23 = vpop.permute.xlu0 %449 }
 0x146   : > { %v574_v10 = vsel %vm399_vm3, %v1827_v9, %v1811_v60  ;;  %v575_v60 = vsel %vm399_vm3, %v1819_v0, %v1827_v9 }
 0x149   : > { %v591_v18 = vpop.permute.xlu1 %590  ;;  %v538_v34 = vpop.permute.xlu0 %537 }
 0x14a   : > { %v592_v1 = vsel %vm419_vm4, %v1817_v63, %v591_v18 }
 0x14b   : > { %v600_v11 = vmul.f32 %v1801_v48, %v592_v1 }
 0x14d   : > { %v452_v24 = vpop.permute.xlu1 %451  ;;  %v587_v5 = vpop.permute.xlu0 %586 }
 0x14e   : > { %v458_v27 = vsel %vm457_vm0, %v450_v23, %v452_v24  ;;  %v459_v28 = vsel %vm457_vm0, %v452_v24, %v454_v8  ;;  %v593_v16 = vsel %vm419_vm4, %v587_v5, %v1817_v63  ;;  %v594_v7 = vsel %vm419_vm4, %v591_v18, %v587_v5 }
 0x14f   : > { %v465_v31 = vadd.f32 %v459_v28, %v431_v25  ;;  %v464_v35 = vadd.f32 %v458_v27, %v430_v30  ;;  %v599_v20 = vmul.f32 %v1801_v48, %v593_v16  ;;  %v582_v24 = vmul.f32 %v1807_v52, %v575_v60 }
 0x150   : > { %v601_v28 = vmul.f32 %v1801_v48, %v594_v7 }
 0x151   : > { %v502_v36 = vadd.f32 %v499_v4, %v465_v31  ;;  %v456_v37 = vpop.permute.xlu1 %455  ;;  %v501_v46 = vadd.f32 %v498_v40, %v464_v35  ;;  %v617_v4 = vld [vmem:[%s1996_s4] sm:$0xff] }
 0x152   : > { %v460_v39 = vsel %vm457_vm0, %v454_v8, %v456_v37  ;;  %v512_v8 = vsel %vm419_vm4, %v1809_v59, %v505_v62  ;;  %v580_v59 = vmul.f32 %v1807_v52, %v574_v10 }
 0x153   : > { %v466_v49 = vadd.f32 %v460_v39, %v432_v42  ;;  %v521_v54 = vadd.f32 %v518_v41, %v502_v36  ;;  %v520_v47 = vadd.f32 %v517_v57, %v501_v46  ;;  %v519_v2 = vmul.f32 %v1803_v50, %v512_v8 }
 0x155   : > { %v540_v53 = vpop.permute.xlu1 %539  ;;  %v503_v13 = vadd.f32 %v500_v55, %v466_v49 }
 0x156   : > { %v545_v3 = vsel %vm543_vm1, %v538_v34, %v540_v53 }
 0x157   : > { %v551_v6 = vadd.f32 %v545_v3, %v521_v54  ;;  %v522_v23 = vadd.f32 %v519_v2, %v503_v13 }
 0x159   : > { %v536_v14 = vpop.permute.xlu1 %535  ;;  %v584_v15 = vadd.f32 %v581_v56, %v551_v6  ;;  %v808_v6 = vshrl.u32 %v397_v58, 7 }
 0x15a   : > { %v544_v17 = vsel %vm543_vm1, %v536_v14, %v538_v34 }
 0x15b   : > { %v550_v62 = vadd.f32 %v544_v17, %v520_v47  ;;  %v603_v19 = vadd.f32 %v600_v11, %v584_v15  ;;  %v809_v10 = vsub.s32 0, %v808_v6  ;;  %v805_v11 = vld [vmem:[%s1995_s3] sm:$0x7]  ;;  %v813_v13 = vsub.s32 1, %v808_v6 }
 0x15c   : > { %v817_v47 = vsub.s32 2, %v808_v6 }
 0x15d   : > { %v583_v21 = vadd.f32 %v580_v59, %v550_v62  ;;  %v542_v22 = vpop.permute.xlu1 %541  ;;  %v612_v63 = vadd.f32 %v1805_v51, %v603_v19  ;;  %v810_v14 = vrot.slane %v805_v11, %v809_v10  ;;  %v814_v16 = vrot.slane %v805_v11, %v813_v13 }
 0x15e   : > { %v546_v50 = vsel %vm543_vm1, %v540_v53, %v542_v22  ;;  %v620_v30 = vpop.permute.xlu0 %619  ;;  %v818_v62 = vrot.slane %v805_v11, %v817_v47 }
 0x15f   : > { %v552_v25 = vadd.f32 %v546_v50, %v522_v23  ;;  %v615_v26 = vmax.f32 %v612_v63, 0.0  ;;  %v602_v27 = vadd.f32 %v599_v20, %v583_v21  ;;  %v829_v63 = vld [vmem:[%s1997_s5] sm:$0xff]  ;;  %v830_v50 = vld [vmem:[%s1997_s5 + $0x8] sm:$0xff] }
 0x161   : > { %v585_v0 = vadd.f32 %v582_v24, %v552_v25  ;;  %626 = vmatprep.subr.mxu0 %v615_v26  ;;  %v611_v9 = vadd.f32 %v1805_v51, %v602_v27  ;;  %v1536_v24 = vmov 0.0|0.0   ;;  %v832_v25 = vld [vmem:[%s1998_s6 + $0x8] sm:$0xff]  ;;  %v831_v26 = vld [vmem:[%s1998_s6] sm:$0xff] }
 0x163   : > { %v614_v29 = vmax.f32 %v611_v9, 0.0  ;;  %v604_v61 = vadd.f32 %v601_v28, %v585_v0 }
 0x165   : > { %627 = vmatpush1.msra.mxu0 %v614_v29  ;;  %v613_v18 = vadd.f32 %v1805_v51, %v604_v61 }
 0x166   : > { %1267 = vmatmul.mubr.msk.f32.vlgmr.msra.gmra.mrb[0].mxu0 %vm622_vm5, %v617_v4 }
 0x167   : > { %v616_v52 = vmax.f32 %v613_v18, 0.0  ;;  %1301 = vmatprep.mubr.msk.f32.mxu0 %vm622_vm5, %v829_v63 }
 0x169   : > { %1295 = vmatpush3.msra.mxu1 %v616_v52 }
 0x16a   : > { %1297 = vmatmul.mubr.msk.f32.vlgmr.msra.gmra.mrb[0].mxu1 %vm622_vm5, %v617_v4  ;;  %1316 = vmatprep.subr.bf16.mxu1 %v1536_v24 }
 0x16b   : > { %1308 = vmatprep.mubr.msk.f32.mxu1 %vm1535_vm2, %v1534_v38 }
 0x16e   : > { %v772_v48 = vpop.permute.xlu1 %771 }
 0x173   : > { %v779_v39 = vpop.permute.xlu1 %778 }
 0x239   : > { %v692_v31 = vpop.f32.mrb[0].mxu0 }
 0x23a   : > { %v693_v32 = vadd.f32 %v692_v31, %v620_v30  ;;  %v694_v33 = vpop.f32.mrb[1].mxu0 }
 0x23b   : > { %v695_v34 = vadd.f32 %v694_v33, %v620_v30 }
 0x23c   : > { %v767_v35 = vmax.f32 %v693_v32, 0.0 }
 0x23d   : > { %v768_v36 = vmax.f32 %v695_v34, 0.0  ;;  %v763_v37 = vpop.f32.mrb[0].mxu1  ;;  %v928_v34 = vld [vmem:[%s1999_s7] sm:$0xff] }
 0x23e   : > { %v774_v51 = vmul.f32 %v772_v48, %v767_v35  ;;  %v764_v40 = vadd.f32 %v763_v37, %v620_v30  ;;  %v1298_v41 = vpop.f32.mrb[1].mxu1  ;;  %v930_v35 = vpop.permute.xlu1 %929 }
 0x23f   : > { %v775_v42 = vmul.f32 %v772_v48, %v768_v36 }
 0x240   : > { %v769_v43 = vmax.f32 %v764_v40, 0.0  ;;  %v781_v44 = vadd.f32 %v779_v39, %v774_v51 }
 0x241   : > { %v782_v45 = vadd.f32 %v779_v39, %v775_v42 }
 0x242   : > { %v776_v46 = vmul.f32 %v772_v48, %v769_v43  ;;  %v1269_v49 = vmul.f32 -1.442695, %v781_v44  ;;  %v1021_v43 = vld [vmem:[%s2001_s9] sm:$0xff] }
 0x243   : > { %v1270_v53 = vmul.f32 -1.442695, %v782_v45 }
 0x244   : > { %v783_v54 = vadd.f32 %v779_v39, %v776_v46  ;;  %1398 = vpow2.f32 %v1269_v49  ;;  %v1020_v49 = vld [vmem:[%s2000_s8] sm:$0xff] }
 0x245   : > { %1400 = vpow2.f32 %v1270_v53 }
 0x246   : > { %v1271_v1 = vmul.f32 -1.442695, %v783_v54 }
 0x248   : > { %1402 = vpow2.f32 %v1271_v1 }
 0x24e   : > { %v1399_v3 = vpop.eup %1398 }
 0x24f   : > { %v1401_v55 = vpop.eup %1400  ;;  %v793_v57 = vadd.f32 1.0, %v1399_v3 }
 0x250   : > { %v794_v56 = vadd.f32 1.0, %v1401_v55 }
 0x251   : > { %1404 = vrcp.f32 %v793_v57 }
 0x252   : > { %v1403_v5 = vpop.eup %1402  ;;  %1406 = vrcp.f32 %v794_v56 }
 0x253   : > { %v795_v8 = vadd.f32 1.0, %v1403_v5 }
 0x255   : > { %1408 = vrcp.f32 %v795_v8 }
 0x25b   : > { %v1405_v15 = vpop.eup %1404 }
 0x25c   : > { %v1407_v17 = vpop.eup %1406  ;;  %v1905_v2 = vadd.f32 %v1405_v15, %v781_v44 }
 0x25d   : > { %v1907_v59 = vadd.f32 %v1407_v17, %v782_v45 }
 0x25e   : > { %v822_v58 = vmul.f32 %v810_v14, %v1905_v2 }
 0x25f   : > { %v1409_v19 = vpop.eup %1408  ;;  %v823_v60 = vmul.f32 %v814_v16, %v1907_v59 }
 0x260   : > { %v804_v20 = vadd.f32 %v1409_v19, %v783_v54 }
 0x261   : > { %v825_v21 = vadd.f32 %v823_v60, %v822_v58 }
 0x262   : > { %v824_v22 = vmul.f32 %v818_v62, %v804_v20 }
 0x264   : > { %v826_v23 = vadd.f32 %v825_v21, %v824_v22 }
 0x266   : > { %827 = vadd.xlane.f32.xlu0 %v826_v23 }
 0x2f3   : > { %v828_v7 = vpop.xlane.xlu0 %827 }
 0x2f4   : > { %1299 = vmatprep.subr.mxu0 %v828_v7 }
 0x2f5   : > { %1300 = vmatpush3.msra.mxu0 %v828_v7 }
 0x2f6   : > { %1302 = vmatmul.mubr.msk.f32.vlgmr.msra.gmra.mrb[2].mxu0 %vm622_vm5, %v830_v50 }
 0x2f7   : > { %1094 = vmatprep.mubr.f32.mxu0 %v1534_v38 }
 0x3c9   : > { %v1303_v27 = vpop.f32.mrb[2].mxu0 }
 0x3ca   : > { %v911_v28 = vadd.f32 %v1303_v27, %v832_v25  ;;  %v905_v0 = vpop.f32.mrb[3].mxu0 }
 0x3cb   : > { %v906_v9 = vadd.f32 %v905_v0, %v831_v26 }
 0x3cc   : > { %v1275_v29 = vmul.f32 -1.442695, %v911_v28 }
 0x3cd   : > { %v1274_v4 = vmul.f32 -1.442695, %v906_v9 }
 0x3ce   : > { %1410 = vpow2.f32 %v1275_v29 }
 0x3cf   : > { %1412 = vpow2.f32 %v1274_v4 }
 0x3d8   : > { %v1411_v61 = vpop.eup %1410 }
 0x3d9   : > { %v1413_v18 = vpop.eup %1412  ;;  %v921_v52 = vadd.f32 1.0, %v1411_v61 }
 0x3da   : > { %v920_v12 = vadd.f32 1.0, %v1413_v18 }
 0x3db   : > { %1414 = vrcp.f32 %v921_v52 }
 0x3dc   : > { %1416 = vrcp.f32 %v920_v12 }
 0x3e5   : > { %v1415_v48 = vpop.eup %1414 }
 0x3e6   : > { %v1417_v30 = vpop.eup %1416  ;;  %v927_v31 = vadd.f32 %v1415_v48, %v911_v28 }
 0x3e7   : > { %v926_v32 = vadd.f32 %v1417_v30, %v906_v9 }
 0x3e9   : > { %v1317_v33 = vpack.c.bf16 %v927_v31, %v926_v32 }
 0x3eb   : > { %1318 = vmatpush3.bf16.msra.mxu1 %v1317_v33 }
 0x3ec   : > { %1311 = vmatprep.subr.mxu1 %v1534_v38 }
 0x3ee   : > { %1309 = vmatmul.mubr.msk.f32.vlgmr.msra.gmra.mrb[2].mxu1 %vm932_vm6, %v928_v34 }
 0x3ef   : > { %1313 = vmatprep.mubr.msk.f32.mxu1 %vm1535_vm2, %v1534_v38 }
 0x4c1   : > { %v1002_v36 = vpop.f32.mrb[2].mxu1 }
 0x4c2   : > { %v1003_v37 = vadd.f32 %v1002_v36, %v930_v35  ;;  %v1310_v39 = vpop.f32.mrb[3].mxu1 }
 0x4c4   : > { %v1277_v51 = vmul.f32 -1.442695, %v1003_v37 }
 0x4c6   : > { %1418 = vpow2.f32 %v1277_v51 }
 0x4d0   : > { %v1419_v40 = vpop.eup %1418 }
 0x4d1   : > { %v1009_v41 = vadd.f32 1.0, %v1419_v40 }
 0x4d3   : > { %1420 = vrcp.f32 %v1009_v41 }
 0x4dd   : > { %v1421_v42 = vpop.eup %1420 }
 0x4de   : > { %1014 = vperm.xlu1 %1396, %v1421_v42  }
 0x4e2   : > { %1024 = vperm.xlu1 %1396, %v1021_v43  }
 0x55d   : > { %v1015_v44 = vpop.permute.xlu1 %1014 }
 0x55e   : > { %v1017_v38 = vmul.f32 %v1015_v44, %v1905_v2  ;;  %v1018_v45 = vmul.f32 %v1015_v44, %v1907_v59  ;;  %v1019_v46 = vmul.f32 %v1015_v44, %v804_v20 }
 0x560   : > { %1030 = vmatprep.subr.mxu0 %v1018_v45  ;;  %1312 = vmatpush3.msra.mxu1 %v1019_v46 }
 0x561   : > { %1031 = vmatpush1.msra.mxu0 %v1017_v38  ;;  %1314 = vmatmul.mubr.msk.f32.vlgmr.msra.gmra.mrb[4].mxu1 %vm622_vm5, %v1020_v49  ;;  %v1025_v53 = vpop.permute.xlu1 %1024 }
 0x562   : > { %1278 = vmatmul.mubr.msk.f32.vlgmr.msra.gmra.mrb[4].mxu0 %vm622_vm5, %v1020_v49 }
 0x634   : > { %v1167_v54 = vpop.f32.mrb[4].mxu1 }
 0x635   : > { %v1168_v1 = vadd.f32 %v1167_v54, %v1025_v53  ;;  %v1096_v3 = vpop.f32.mrb[4].mxu0  ;;  %v1315_v55 = vpop.f32.mrb[5].mxu1 }
 0x636   : > { %v1097_v57 = vadd.f32 %v1096_v3, %v1025_v53  ;;  %v1098_v56 = vpop.f32.mrb[5].mxu0 }
 0x637   : > { %1173 = vst [vmem:[%s375_s22 + $0x10] sm:$0xff] %v1168_v1  ;;  %v1099_v5 = vadd.f32 %v1098_v56, %v1025_v53 }
 0x638   : > { %1171 = vst [vmem:[%s375_s22] sm:$0xff] %v1097_v57 }
 0x639   : > { %1172 = vst [vmem:[%s375_s22 + $0x8] sm:$0xff] %v1099_v5 }
 0x63a   : > { %1465 = shalt.err (!%p1462_p4)
}
 0x63b   : > { %s1466_s28 = scalar_lea.hbm %s1948_s12, 384  ;;  %s1470_s22 = scalar_lea.hbm %s2002_s10, 768 }
 0x63c   : > { %p1467_p5 = scmp.ne.s32.totalorder %s1948_s12, %s1466_s28  ;;  %p1471_p0 = scmp.lt.u32.totalorder %s1948_s12, %s2002_s10 }
 0x63d   : > { %p1472_p1 = scmp.lt.u32.totalorder %s1470_s22, %s1466_s28  ;;  %p1474_p6 = scmp.lt.u32.totalorder %s1466_s28, %s1948_s12 }
 0x63e   : > { %p1468_p8 = pnand %p1467_p5, %p2012_p11 }
 0x63f   : > { %p1473_p3 = por %p1472_p1, %p1471_p0 }
 0x640   : > { %p1469_p9 = pneg %p1468_p8 }
 0x641   : > { %p1475_p12 = por %p1474_p6, %p1473_p3 }
 0x643   : > { %p1476_p13 = pnand %p1475_p12, %p1469_p9 }
 0x645   : > { %1479 = shalt.err (!%p1476_p13)
}
 0x646   : > { %1323 = dma.vmem_to_hbm [thread:$0]  (%p2012_p11), %s1950_s11, 384, %s1948_s12, %s1175_s17  }
 0x647 PF: > { %s1201_s20 = sand.u32 1, %s1506_s13   ;;  %p2013_p7 = scmp.ne.s32.totalorder %s2008_s26, 0 }
 0x648   : > { %p2014_p10 = scmp.ge.s32.totalorder %s1518_s16, 2  ;;  %s1202_s21 = scalar_lea.sflag [#allocation4], %s1201_s20 }
 0x64a   : > { %p1330_p2 = pnand %p2014_p10, %p2013_p7 }
 0x64c   : > { %1501 = dma.done.wait (!%p1330_p2), %s1202_s21, 384  }
 0x64d   : > { %1503 = vsyncadd (!%p1330_p2), %s1202_s21, 4294966912  ;;  %s2015_s24 = sld [smem:[#allocation8_spill]]  ;;  %p23_p4 = scmp.ge.s32.totalorder %s1619_s19, 4  }
 0x64e   : > { %s2016_s13 = smov %s1510_s14  ;;  %s2017_s14 = smov %s1514_s15 }
 0x64f   : > { %s2019_s16 = smov %s1619_s19  ;;  %25 = sbr.rel (!%p23_p4) target bundleno = 5 (0x5), region = 105 }
 0x653   : > { %s2018_s15 = smov %s2015_s24 }
 0x656   :  { %1207 = vsyncpa [#allocation3], 1 }
 0x657   :  { %1209 = vsyncpa [#allocation3 + $0x1], 1 }
 0x658   :  { %1210 = vsyncpa [#allocation4], 1 }
 0x659   :  { %1212 = vsyncpa [#allocation4 + $0x1], 1 }

</bundles_post_ra>
